<compile_context>
chip_gen: v5e
topology: v5e:2x2
jax: 0.10.0
libtpu: 0.0.40
codegen_flags: <defaults>
</compile_context>

<pallas_src>
import functools

import numpy as np
import jax
import jax.numpy as jnp
from jax import lax
from jax.experimental import pallas as pl
from jax.experimental.pallas import tpu as pltpu


_GROUP = 8  # one full sublane group of channels


def _round_up(n, m):
    return ((n + m - 1) // m) * m


# ---------------------------------------------------------------------------
# Pallas kernel: per-edge feature weights (lane-dense, flattened spatial axis)
# ---------------------------------------------------------------------------
def _edge_weight_kernel(fm_ref, w_ref, *, width):
    """fm_ref: (C, HW) guide for one batch item;  w_ref: (2, HW) edge weights.

      w_ref[0, p] = sum_c (x[c, p] - x[c, p - W])^2 + 1   vertical   edge (p-W, p)
      w_ref[1, p] = sum_c (x[c, p] - x[c, p - 1])^2 + 1   horizontal edge (p-1, p)

    Wrap-around positions (p < W, p % W == 0) hold garbage and are masked by the
    self-loop entries produced by build_matrix_index (lock-step enumeration).
    """
    num_c, hw = fm_ref.shape

    def contrib(x):  # x: (g, hw) f32 -> ((1, hw), (1, hw)) squared-diff sums
        d_r = x - pltpu.roll(x, width, axis=1)   # x[:, p] - x[:, p - W]
        d_c = x - pltpu.roll(x, 1, axis=1)       # x[:, p] - x[:, p - 1]
        return (jnp.sum(d_r * d_r, axis=0, keepdims=True),
                jnp.sum(d_c * d_c, axis=0, keepdims=True))

    if num_c <= _GROUP:
        # Whole channel axis fits one sublane group: single dense pass.
        acc_r, acc_c = contrib(fm_ref[...].astype(jnp.float32))
    else:
        n_full = num_c // _GROUP
        rem = num_c - n_full * _GROUP
        acc_r = jnp.zeros((1, hw), jnp.float32)
        acc_c = jnp.zeros((1, hw), jnp.float32)
        if n_full >= 4:
            # Many channels: visible loop over aligned full-sublane groups keeps
            # code size and vreg pressure bounded (full unroll at C=256 bloats
            # the bundle stream).
            def body(g, carry):
                ar, ac = carry
                c0 = pl.multiple_of(g * _GROUP, _GROUP)
                r, c = contrib(fm_ref[pl.ds(c0, _GROUP), :].astype(jnp.float32))
                return ar + r, ac + c

            acc_r, acc_c = lax.fori_loop(0, n_full, body, (acc_r, acc_c),
                                         unroll=2)
        else:
            for g in range(n_full):
                r, c = contrib(
                    fm_ref[g * _GROUP:(g + 1) * _GROUP, :].astype(jnp.float32))
                acc_r = acc_r + r
                acc_c = acc_c + c
        if rem:
            r, c = contrib(fm_ref[n_full * _GROUP:, :].astype(jnp.float32))
            acc_r = acc_r + r
            acc_c = acc_c + c

    w_ref[0:1, :] = acc_r + 1.0
    w_ref[1:2, :] = acc_c + 1.0


def build_feature_weight(fm):
    """fm: (B, C, H, W) f32/bf16 -> weight (B, 2*H*W) f32 (padded edge enumeration)."""
    B, C, H, W = fm.shape
    HW = H * W
    fm_flat = fm.reshape(B, C, HW)                    # contiguous -> free reshape
    itemsize = jnp.dtype(fm_flat.dtype).itemsize      # bf16 guides accepted as-is

    # Padded, double-buffered VMEM working set for one grid step (one guide):
    # input block pads C -> ceil(C/8)*8 sublanes, HW -> ceil(HW/128)*128 lanes;
    # output block pads 2 -> 8 sublanes and is always f32.
    hw_pad = _round_up(HW, 128)
    in_blk = _round_up(C, _GROUP) * hw_pad * itemsize
    out_blk = 8 * hw_pad * 4
    vmem_need = 2 * (in_blk + out_blk)

    compiler_kwargs = dict(dimension_semantics=("parallel",))
    if vmem_need > 12 * 1024 * 1024:                  # above default scoped limit
        compiler_kwargs["vmem_limit_bytes"] = int(min(vmem_need + (4 << 20),
                                                      40 << 20))
    # TODO(synk): for guides whose padded per-item working set exceeds ~40 MiB
    # (v7x only has 64 MiB VMEM), add a second parallel grid axis over spatial
    # stripes of whole rows with a one-row halo instead of growing the limit.
    # TODO(synk): when B is very large and C*H*W is tiny, batching a few items
    # per grid step would amortize the ~0.35us per-step overhead; grid length
    # (pipelining + megacore sharding) is prioritized here.

    weight = pl.pallas_call(
        functools.partial(_edge_weight_kernel, width=W),
        out_shape=jax.ShapeDtypeStruct((B, 2, HW), jnp.float32),
        grid=(B,),
        in_specs=[pl.BlockSpec((None, C, HW), lambda i: (i, 0, 0))],
        out_specs=pl.BlockSpec((None, 2, HW), lambda i: (i, 0, 0)),
        compiler_params=pltpu.CompilerParams(**compiler_kwargs),
        cost_estimate=pl.CostEstimate(
            flops=int(6 * B * C * HW + 2 * B * HW),
            transcendentals=0,
            bytes_accessed=int(B * C * HW * itemsize + B * 2 * HW * 4)),
    )(fm_flat)
    return weight.reshape(B, 2 * HW)                  # row-edge plane then col-edge plane


# ---------------------------------------------------------------------------
# Plain-JAX glue: edge-index table matching the kernel's padded enumeration
# ---------------------------------------------------------------------------
def build_matrix_index(batch, height, width):
    # Lock-step with _edge_weight_kernel: positions p < W (vertical plane) and
    # p % W == 0 (horizontal plane) become self-loops so the kernel's roll
    # wrap-around values are never selectable.
    hw = height * width
    p = jnp.arange(hw, dtype=jnp.int32)
    row_u = jnp.where(p >= width, p - width, p)       # edge (p-W, p); self-loop at top row
    col_u = jnp.where((p % width) != 0, p - 1, p)     # edge (p-1, p); self-loop at col 0
    index = jnp.concatenate(
        [jnp.stack([row_u, p], axis=1),
         jnp.stack([col_u, p], axis=1)], axis=0)      # (2*HW, 2)
    return jnp.broadcast_to(index[None], (batch, 2 * hw, 2))


# ---------------------------------------------------------------------------
# Boruvka minimum spanning tree (replaces the external CUDA `mst` op)
# ---------------------------------------------------------------------------
def _boruvka_mst(edges, weights, num_vertices):
    # TODO(synk): Boruvka union-find contraction (data-dependent gather/scatter)
    # is kept in plain JAX — the MST graph step has no clean Pallas TPU mapping
    # and likely dominates end-to-end latency.
    E = edges.shape[0]
    V = num_vertices
    n_levels = int(np.ceil(np.log2(max(V, 2)))) + 1
    u = edges[:, 0].astype(jnp.int32)
    v = edges[:, 1].astype(jnp.int32)
    idx_v = jnp.arange(V, dtype=jnp.int32)
    idx_e = jnp.arange(E, dtype=jnp.int32)
    inf = jnp.float32(jnp.inf)

    def one_round(carry, _):
        parent, selected = carry
        # pointer-jump to the component root
        root = parent
        for _ in range(n_levels):
            root = root[root]
        ru, rv = root[u], root[v]
        cross = ru != rv                              # self-loops are never cross
        w = jnp.where(cross, weights, inf)
        # per-component minimum outgoing weight
        min_w = jnp.minimum(jax.ops.segment_min(w, ru, num_segments=V),
                            jax.ops.segment_min(w, rv, num_segments=V))
        # lexicographic (weight, edge-index) arg-min per component
        is_min_u = cross & (w == min_w[ru])
        is_min_v = cross & (w == min_w[rv])
        cand_u = jnp.where(is_min_u, idx_e, E)
        cand_v = jnp.where(is_min_v, idx_e, E)
        chosen = jnp.minimum(jax.ops.segment_min(cand_u, ru, num_segments=V),
                             jax.ops.segment_min(cand_v, rv, num_segments=V))
        has_edge = chosen < E
        selected = selected.at[jnp.where(has_edge, chosen, E)].set(True, mode="drop")
        # hook each component to the other endpoint's component
        ce = jnp.where(has_edge, chosen, 0)
        eu, ev = ru[ce], rv[ce]
        other = jnp.where(eu == idx_v, ev, eu)
        parent = jnp.where((root == idx_v) & has_edge, other, root)
        # break mutual (2-cycle) hooks: keep the smaller id as root
        pp = parent[parent]
        parent = jnp.where((pp == idx_v) & (idx_v < parent), idx_v, parent)
        return (parent, selected), None

    init = (idx_v, jnp.zeros((E,), dtype=jnp.bool_))
    (_, selected), _ = lax.scan(one_round, init, None, length=n_levels)
    # gather the V-1 selected edges (sorted by edge index)
    order = jnp.argsort(jnp.where(selected, idx_e, E))
    sel_idx = order[: V - 1]
    return edges[sel_idx]


# ---------------------------------------------------------------------------
# Module forward
# ---------------------------------------------------------------------------
@jax.jit
def mst_forward(guide_in):
    """guide_in: (B, C, H, W) -> tree edges: (B, H*W - 1, 2) int32."""
    B, C, H, W = guide_in.shape
    index = build_matrix_index(B, H, W)          # (B, 2*H*W, 2) int32
    weight = build_feature_weight(guide_in)      # (B, 2*H*W)    f32 (Pallas kernel)
    V = H * W
    edges0 = index[0]
    return jax.vmap(lambda w: _boruvka_mst(edges0, w, V))(weight)


class MinimumSpanningTree:
    """Mirror of the PyTorch module (norm2 distance_func, no learnable params)."""

    def __init__(self, distance_func=None):
        # TODO(synk): arbitrary python distance_func callbacks cannot be traced into
        # the Pallas kernel; the standard norm2 distance is baked in.
        self.distance_func = distance_func

    def __call__(self, guide_in):
        return mst_forward(guide_in)


# ---------------------------------------------------------------------------
if __name__ == "__main__":
    key = jax.random.PRNGKey(0)
    B, C, H, W = 2, 4, 16, 16
    x = jax.random.normal(key, (B, C, H, W), dtype=jnp.float32)

    module = MinimumSpanningTree()
    tree = jax.block_until_ready(module(x))

    V = H * W
    tree_np = np.asarray(tree)
    assert tree_np.shape == (B, V - 1, 2) and tree_np.dtype == np.int32

    def weight_ref_np(x_np):
        wr = ((x_np[:, :, :-1, :] - x_np[:, :, 1:, :]) ** 2).sum(1) + 1.0
        wc = ((x_np[:, :, :, :-1] - x_np[:, :, :, 1:]) ** 2).sum(1) + 1.0
        return wr, wc

    # --- verify the Pallas edge weights (f32 guide) against numpy ---
    w = np.asarray(jax.block_until_ready(build_feature_weight(x)))      # (B, 2*HW)
    wr_ref, wc_ref = weight_ref_np(np.asarray(x))
    w_row = w[:, :V].reshape(B, H, W)
    w_col = w[:, V:].reshape(B, H, W)
    np.testing.assert_allclose(w_row[:, 1:, :], wr_ref, rtol=1e-5, atol=1e-5)
    np.testing.assert_allclose(w_col[:, :, 1:], wc_ref, rtol=1e-5, atol=1e-5)

    # --- bf16 guides accepted (halved HBM reads); f32 math inside the kernel ---
    x_bf = x.astype(jnp.bfloat16)
    w_bf = np.asarray(jax.block_until_ready(build_feature_weight(x_bf)))
    wr_bf, wc_bf = weight_ref_np(np.asarray(x_bf.astype(jnp.float32)))
    np.testing.assert_allclose(w_bf[:, :V].reshape(B, H, W)[:, 1:, :], wr_bf,
                               rtol=1e-4, atol=1e-4)
    np.testing.assert_allclose(w_bf[:, V:].reshape(B, H, W)[:, :, 1:], wc_bf,
                               rtol=1e-4, atol=1e-4)

    # --- exercise the grouped-channel paths (static groups, fori_loop + tail) ---
    for cc, hh, ww in [(20, 8, 24), (36, 8, 24)]:
        xg = jax.random.normal(jax.random.PRNGKey(cc), (2, cc, hh, ww),
                               dtype=jnp.float32)
        wg = np.asarray(jax.block_until_ready(build_feature_weight(xg)))
        wrg, wcg = weight_ref_np(np.asarray(xg))
        vg = hh * ww
        np.testing.assert_allclose(wg[:, :vg].reshape(2, hh, ww)[:, 1:, :], wrg,
                                   rtol=1e-4, atol=1e-4)
        np.testing.assert_allclose(wg[:, vg:].reshape(2, hh, ww)[:, :, 1:], wcg,
                                   rtol=1e-4, atol=1e-4)

    # --- verify the returned tree is a spanning tree with MST total weight ---
    index_np = np.asarray(build_matrix_index(B, H, W))[0]               # (2*HW, 2)

    def kruskal_total(edges, wts, nv):
        parent = list(range(nv))

        def find(a):
            while parent[a] != a:
                parent[a] = parent[parent[a]]
                a = parent[a]
            return a

        total, cnt = 0.0, 0
        for e in np.argsort(wts, kind="stable"):
            a, b = int(edges[e, 0]), int(edges[e, 1])
            if a == b:
                continue
            ra, rb = find(a), find(b)
            if ra != rb:
                parent[ra] = rb
                total += float(wts[e])
                cnt += 1
        return total, cnt

    for b in range(B):
        wmap = {}
        for (p, q), wv in zip(index_np, w[b]):
            p, q = int(p), int(q)
            if p != q:
                wmap[(p, q)] = float(wv)
        parent = list(range(V))

        def find(a):
            while parent[a] != a:
                parent[a] = parent[parent[a]]
                a = parent[a]
            return a

        tot = 0.0
        for p, q in tree_np[b]:
            p, q = int(p), int(q)
            assert (p, q) in wmap, "tree edge not in grid graph"
            tot += wmap[(p, q)]
            rp, rq = find(p), find(q)
            assert rp != rq, "cycle in returned tree"
            parent[rp] = rq
        ref_tot, ref_cnt = kruskal_total(index_np, w[b], V)
        assert ref_cnt == V - 1
        assert abs(tot - ref_tot) <= 1e-3 * max(1.0, abs(ref_tot)), (tot, ref_tot)

    print("KERNEL_OK")
</pallas_src>

<mosaic_0001>
module attributes {stable_mosaic.version = 11 : i64} {
  func.func @_edge_weight_kernel(%arg0: i32, %arg1: memref<1x4x256xf32, #tpu.memory_space<vmem>>, %arg2: memref<1x2x256xf32, #tpu.memory_space<vmem>>) attributes {dimension_semantics = [#tpu.dimension_semantics<parallel>], iteration_bounds = array<i64: 2>, scalar_prefetch = 0 : i64, scratch_operands = 0 : i64, tpu.core_type = #tpu.core_type<tc>, window_params = [{transform_indices = @transform_0, window_bounds = array<i64: 1, 4, 256>}, {transform_indices = @transform_1, window_bounds = array<i64: 1, 2, 256>}]} {
    %c0 = arith.constant 0 : index
    %c0_0 = arith.constant 0 : index
    %c0_1 = arith.constant 0 : index
    %0 = vector.load %arg1[%c0, %c0_0, %c0_1] : memref<1x4x256xf32, #tpu.memory_space<vmem>>, vector<1x4x256xf32>
    %1 = vector.shape_cast %0 : vector<1x4x256xf32> to vector<4x256xf32>
    %c16_i32 = arith.constant 16 : i32
    %2 = tpu.dynamic_rotate %1 by %c16_i32 dim 1 : vector<4x256xf32>, i32 -> vector<4x256xf32>
    %3 = arith.subf %1, %2 : vector<4x256xf32>
    %c1_i32 = arith.constant 1 : i32
    %4 = tpu.dynamic_rotate %1 by %c1_i32 dim 1 : vector<4x256xf32>, i32 -> vector<4x256xf32>
    %5 = arith.subf %1, %4 : vector<4x256xf32>
    %6 = arith.mulf %3, %3 : vector<4x256xf32>
    %cst = arith.constant dense<0.000000e+00> : vector<256xf32>
    %7 = vector.multi_reduction <add>, %6, %cst [0] : vector<4x256xf32> to vector<256xf32>
    %8 = vector.shape_cast %7 : vector<256xf32> to vector<1x256xf32>
    %9 = arith.mulf %5, %5 : vector<4x256xf32>
    %cst_2 = arith.constant dense<0.000000e+00> : vector<256xf32>
    %10 = vector.multi_reduction <add>, %9, %cst_2 [0] : vector<4x256xf32> to vector<256xf32>
    %11 = vector.shape_cast %10 : vector<256xf32> to vector<1x256xf32>
    %cst_3 = arith.constant 1.000000e+00 : f32
    %12 = vector.broadcast %cst_3 : f32 to vector<1x256xf32>
    %13 = arith.addf %8, %12 : vector<1x256xf32>
    %c0_4 = arith.constant 0 : index
    %c0_5 = arith.constant 0 : index
    %c0_6 = arith.constant 0 : index
    %14 = vector.load %arg2[%c0_4, %c0_5, %c0_6] : memref<1x2x256xf32, #tpu.memory_space<vmem>>, vector<1x1x256xf32>
    %15 = vector.shape_cast %14 : vector<1x1x256xf32> to vector<1x256xf32>
    %16 = vector.shape_cast %13 : vector<1x256xf32> to vector<1x1x256xf32>
    tpu.vector_store %arg2[%c0_4, %c0_5, %c0_6], %16 {strides = array<i32>} : memref<1x2x256xf32, #tpu.memory_space<vmem>>, vector<1x1x256xf32>,
    %cst_7 = arith.constant 1.000000e+00 : f32
    %17 = vector.broadcast %cst_7 : f32 to vector<1x256xf32>
    %18 = arith.addf %11, %17 : vector<1x256xf32>
    %c0_8 = arith.constant 0 : index
    %c1 = arith.constant 1 : index
    %c0_9 = arith.constant 0 : index
    %19 = vector.load %arg2[%c0_8, %c1, %c0_9] : memref<1x2x256xf32, #tpu.memory_space<vmem>>, vector<1x1x256xf32>
    %20 = vector.shape_cast %19 : vector<1x1x256xf32> to vector<1x256xf32>
    %21 = vector.shape_cast %18 : vector<1x256xf32> to vector<1x1x256xf32>
    tpu.vector_store %arg2[%c0_8, %c1, %c0_9], %21 {strides = array<i32>} : memref<1x2x256xf32, #tpu.memory_space<vmem>>, vector<1x1x256xf32>,
    return
  }
  func.func @transform_0(%arg0: i32) -> (i32, i32, i32) {
    %c0_i32 = arith.constant 0 : i32
    %c0_i32_0 = arith.constant 0 : i32
    %c0_i32_1 = arith.constant 0 : i32
    return %arg0, %c0_i32, %c0_i32_0 : i32, i32, i32
  }
  func.func @transform_1(%arg0: i32) -> (i32, i32, i32) {
    %c0_i32 = arith.constant 0 : i32
    %c0_i32_0 = arith.constant 0 : i32
    %c0_i32_1 = arith.constant 0 : i32
    return %arg0, %c0_i32, %c0_i32_0 : i32, i32, i32
  }
}

</mosaic_0001>

<bundles_post_ra>
// kernel: mst_forward.1
= control target key start
LH: loop header
LB: loop body
LE: loop exit
PB: predicated region body
PF: predicated region fallthrough
CT: control target
= control target key end

     0   :  { %s321_s6 = smov 0   ;;  %s358_s0 = inlined_call_operand.vmem [shape: f32[2,4,256], index: 0, kind: input, shape index: {}]   ;;  %s359_s1 = inlined_call_operand.vmem [shape: f32[2,2,256], index: 1, kind: output, shape index: {}]  }
   0x1 LB: > { %s277_s7 = sadd.s32 4294967295, %s307_s6   ;;  %p281_p0 = scmp.ge.s32.totalorder %s307_s6, 1  ;;  %s307_s6 = sphi %s321_s6, %s11_s6  }
   0x2   : > { %p87_p1 = scmp.lt.s32.totalorder %s307_s6, 3 }
   0x4   : > { %p88_p2 = pnand %p281_p0, %p87_p1 }
   0x5   : > { %p107_p3 = scmp.lt.s32.totalorder (!%p88_p2), %s277_s7, 1  ;;  %s309_s12 = smov (!%p88_p2), 16  }
   0x6   : > { %91 = sbr.rel (%p88_p2) target bundleno = 189 (0xbd), region = 24  ;;  %s310_s13 = smov (!%p88_p2), 1  }
   0xb   : > { %s363_s7 = smov (!%p107_p3, %s277_s7), 1  ;;  %v128_v5 = vlaneseq  ;;  %vm136_vm1 = vcmask 1043456   ;;  %vm205_vm3 = vcmask 1040384  }
   0xc   : > { %s289_s8 = sshll.u32 %s363_s7, 3  ;;  %s290_s14 = sshll.u32 %s363_s7, 2 }
   0xd   : > { %s111_s11 = scalar_lea.vmem %s358_s0, %s289_s8  ;;  %v129_v7 = vand.u32 127, %v128_v5  ;;  %vm342_vm4 = vcmp.lt.s32.totalorder %v128_v5, 256  ;;  %s116_s17 = scalar_lea.vmem %s359_s1, %s290_s14 }
   0xe   : > { %v117_v0 = vld [vmem:[%s111_s11] sm:$0xff] }
   0xf   : > { %119 = vst [vmem:[#allocation1] ss:$2 sm:$0xff] %v117_v0  ;;  %vm130_vm0 = vcmp.lt.s32.totalorder %v129_v7, 16  ;;  %vm149_vm2 = vcmp.lt.s32.totalorder %v129_v7, 1 }
  0x16   : > { %v120_v1 = vld.sshfl [vmem:[#allocation1] sm:$0xff pattern:$0x75316420]  ;;  %v121_v2 = vld.sshfl [vmem:[#allocation1 + $0x8] sm:$0xff pattern:$0x75316420] }
  0x17   : > { %124 = vrot.lane.b32.xlu0 %v120_v1, %s309_s12  ;;  %140 = vst [vmem:[#allocation1] ss:$2 sm:$0xff] %v117_v0 }
  0x1e   : > { %v141_v3 = vld.sshfl [vmem:[#allocation1] sm:$0xff pattern:$0x75316420]  ;;  %v142_v4 = vld.sshfl [vmem:[#allocation1 + $0x8] sm:$0xff pattern:$0x75316420] }
  0x1f   : > { %126 = vrot.lane.b32.xlu0 %v121_v2, %s309_s12  ;;  %145 = vrot.lane.b32.xlu1 %v141_v3, %s310_s13 }
  0x27   : > { %147 = vrot.lane.b32.xlu1 %v142_v4, %s310_s13 }
  0x89   : > { %v125_v6 = vpop.permute.xlu0 %124 }
  0x91   : > { %v127_v8 = vpop.permute.xlu0 %126  ;;  %v146_v9 = vpop.permute.xlu1 %145 }
  0x92   : > { %v131_v10 = vsel %vm130_vm0, %v125_v6, %v127_v8  ;;  %v132_v12 = vsel %vm130_vm0, %v127_v8, %v125_v6 }
  0x93   : > { %v135_v11 = vrot.slane %v131_v10, 4 }
  0x95   : > { %v137_v13 = vsel %vm136_vm1, %v132_v12, %v135_v11 }
  0x96   : > { %v139_v14 = vsub.f32 %v117_v0, %v137_v13 }
  0x98   : > { %v158_v15 = vmul.f32 %v139_v14, %v139_v14 }
  0x99   : > { %v148_v16 = vpop.permute.xlu1 %147 }
  0x9a   : > { %160 = vst [vmem:[#allocation1] ss:$2 sm:$0xff] %v158_v15  ;;  %v150_v17 = vsel %vm149_vm2, %v146_v9, %v148_v16  ;;  %v151_v19 = vsel %vm149_vm2, %v148_v16, %v146_v9 }
  0x9b   : > { %v154_v18 = vrot.slane %v150_v17, 4 }
  0x9d   : > { %v155_v20 = vsel %vm136_vm1, %v151_v19, %v154_v18 }
  0x9e   : > { %v157_v21 = vsub.f32 %v117_v0, %v155_v20 }
  0xa0   : > { %v179_v22 = vmul.f32 %v157_v21, %v157_v21 }
  0xa1   : > { %v161_v23 = vld.sshfl [vmem:[#allocation1] sm:$0xff pattern:$0x75316420]  ;;  %v162_v24 = vld.sshfl [vmem:[#allocation1 + $0x8] sm:$0xff pattern:$0x75316420] }
  0xa2   : > { %v165_v25 = vsel %vm136_vm1, %v161_v23, 0.0  ;;  %v172_v26 = vsel %vm136_vm1, %v162_v24, 0.0  ;;  %181 = vst [vmem:[#allocation1] ss:$2 sm:$0xff] %v179_v22 }
  0xa3   : > { %v166_v27 = vrot.slane %v165_v25, 4  ;;  %v173_v28 = vrot.slane %v172_v26, 4 }
  0xa5   : > { %v167_v29 = vadd.f32 %v166_v27, %v165_v25  ;;  %v174_v30 = vadd.f32 %v173_v28, %v172_v26 }
  0xa7   : > { %v168_v31 = vrot.slane %v167_v29, 2  ;;  %v175_v32 = vrot.slane %v174_v30, 2 }
  0xa9   : > { %v169_v33 = vadd.f32 %v168_v31, %v167_v29  ;;  %v176_v34 = vadd.f32 %v175_v32, %v174_v30  ;;  %v182_v35 = vld.sshfl [vmem:[#allocation1] sm:$0xff pattern:$0x75316420]  ;;  %v183_v36 = vld.sshfl [vmem:[#allocation1 + $0x8] sm:$0xff pattern:$0x75316420] }
  0xaa   : > { %v186_v37 = vsel %vm136_vm1, %v182_v35, 0.0  ;;  %v193_v38 = vsel %vm136_vm1, %v183_v36, 0.0 }
  0xab   : > { %v170_v39 = vrot.slane %v169_v33, 1  ;;  %v177_v40 = vrot.slane %v176_v34, 1  ;;  %v187_v41 = vrot.slane %v186_v37, 4  ;;  %v194_v42 = vrot.slane %v193_v38, 4 }
  0xad   : > { %v171_v43 = vadd.f32 %v170_v39, %v169_v33  ;;  %v178_v44 = vadd.f32 %v177_v40, %v176_v34  ;;  %v188_v45 = vadd.f32 %v187_v41, %v186_v37  ;;  %v195_v46 = vadd.f32 %v194_v42, %v193_v38 }
  0xaf   : > { %v201_v47 = vadd.f32 1.0, %v178_v44  ;;  %v189_v48 = vrot.slane %v188_v45, 2  ;;  %v196_v49 = vrot.slane %v195_v46, 2  ;;  %v200_v51 = vadd.f32 1.0, %v171_v43 }
  0xb1   : > { %v204_v52 = vrot.slane %v201_v47, 7  ;;  %v190_v53 = vadd.f32 %v189_v48, %v188_v45  ;;  %v197_v54 = vadd.f32 %v196_v49, %v195_v46 }
  0xb3   : > { %v206_v55 = vsel %vm205_vm3, %v200_v51, %v204_v52  ;;  %v191_v56 = vrot.slane %v190_v53, 1  ;;  %v198_v57 = vrot.slane %v197_v54, 1 }
  0xb4   : > { %212 = vst.msk [vmem:[%s116_s17] ss:$2 sm:$0x3] %vm342_vm4, %v206_v55 }
  0xb5   : > { %v192_v58 = vadd.f32 %v191_v56, %v190_v53  ;;  %v199_v59 = vadd.f32 %v198_v57, %v197_v54 }
  0xb7   : > { %v214_v60 = vadd.f32 1.0, %v199_v59  ;;  %v213_v61 = vadd.f32 1.0, %v192_v58 }
  0xb9   : > { %v217_v62 = vrot.slane %v214_v60, 7 }
  0xbb   : > { %v218_v63 = vsel %vm205_vm3, %v213_v61, %v217_v62 }
  0xbc   : > { %286 = vst.msk [vmem:[%s116_s17 + $0x1] ss:$2 sm:$0x3] %vm342_vm4, %v218_v63 }
  0xbd PF: > { %s11_s6 = sadd.s32 1, %s307_s6  }
  0xbe   : > { %p8_p4 = scmp.ge.s32.totalorder %s11_s6, 4  }
  0xc0   :  { %10 = sbr.rel (!%p8_p4) target bundleno = 1 (0x1), region = 55 }

</bundles_post_ra>
